<compile_context>
chip_gen: v7x
topology: tpu7x:2x2x1
jax: 0.10.0
libtpu: 0.0.40
codegen_flags: <defaults>
</compile_context>

<pallas_src>
import functools

import jax
import jax.numpy as jnp
from jax.experimental import pallas as pl
from jax.experimental.pallas import tpu as pltpu


def _tv_loss_kernel(img_ref, out_ref, acc_ref, prev_ref, *, tm, wp, h, w):
    i = pl.program_id(0)
    nt = pl.num_programs(0)

    @pl.when(i == 0)
    def _init():
        acc_ref[0, 0] = jnp.float32(0.0)

    x = img_ref[...].astype(jnp.float32)                 # (tm, wp), lane-dense

    col = jax.lax.broadcasted_iota(jnp.int32, (tm, wp), 1)
    row = jax.lax.broadcasted_iota(jnp.int32, (tm, wp), 0)
    grow = row + i * tm                                   # global row index

    # Horizontal diffs: full-shape lane roll + mask (no ragged x[:, 1:]).
    # roll(x, wp-1, axis=1)[r, c] == x[r, (c+1) % wp]
    dh = pltpu.roll(x, shift=wp - 1, axis=1) - x
    h_mask = (col < (w - 1)) & (grow < h)

    # Vertical diffs inside the tile: sublane roll + mask. The wrap row
    # (local row tm-1) is excluded; its real diff is the cross-tile boundary
    # term handled via the carried row below.
    dv = pltpu.roll(x, shift=tm - 1, axis=0) - x
    v_mask = (row < (tm - 1)) & (grow < (h - 1))

    partial = jnp.sum(jnp.where(h_mask, dh * dh, 0.0)
                      + jnp.where(v_mask, dv * dv, 0.0))

    # Cross-tile vertical boundary: first row of this tile minus the carried
    # last row of the previous tile. Valid only if row i*tm is a real row.
    bvalid = (i > 0) & (i * tm < h)
    db = x[0:1, :] - prev_ref[...]
    db2 = jnp.where((col[0:1, :] < w) & bvalid, db * db, 0.0)

    acc_ref[0, 0] = acc_ref[0, 0] + partial + jnp.sum(db2)

    # Carry this tile's last row for the next grid step.
    prev_ref[...] = x[tm - 1:tm, :]

    @pl.when(i == nt - 1)
    def _finalize():
        out_ref[0, 0] = acc_ref[0, 0]


def tv_loss(image, *, tile_bytes=4 * 1024 * 1024, block_rows=None):
    """image: (H, W) float -> scalar float32 TV loss (squared Frobenius norms)."""
    H, W = image.shape
    Wp = 128 * pl.cdiv(W, 128)                 # lane-dense last dim

    if block_rows is None:
        # Cap one tile at ~tile_bytes so 2x double-buffered tiles fit every
        # generation's default scoped-VMEM limit (16 MiB v5e, 32 MiB v6e/v7x).
        block_rows = max(8, (tile_bytes // (Wp * 4)) // 8 * 8)
    tm = max(8, (block_rows // 8) * 8)
    tm = min(tm, 8 * pl.cdiv(H, 8))

    Hp = tm * pl.cdiv(H, tm)
    num_tiles = Hp // tm

    x = image
    if Hp != H or Wp != W:
        # Zero padding; padded rows/cols are masked out inside the kernel.
        x = jnp.pad(x, ((0, Hp - H), (0, Wp - W)))

    kernel = functools.partial(_tv_loss_kernel, tm=tm, wp=Wp, h=H, w=W)
    elem_bytes = jnp.dtype(image.dtype).itemsize

    out = pl.pallas_call(
        kernel,
        out_shape=jax.ShapeDtypeStruct((1, 1), jnp.float32),
        grid_spec=pltpu.PrefetchScalarGridSpec(
            num_scalar_prefetch=0,
            grid=(num_tiles,),
            in_specs=[pl.BlockSpec((tm, Wp), lambda i: (i, 0))],
            out_specs=pl.BlockSpec(memory_space=pltpu.SMEM),
            scratch_shapes=[
                pltpu.SMEM((1, 1), jnp.float32),    # running loss accumulator
                pltpu.VMEM((1, Wp), jnp.float32),   # carried last row of tile
            ],
        ),
        compiler_params=pltpu.CompilerParams(
            dimension_semantics=("arbitrary",),
        ),
        cost_estimate=pl.CostEstimate(
            flops=6 * Hp * Wp,
            transcendentals=0,
            bytes_accessed=Hp * Wp * elem_bytes + 4,
        ),
    )(x)
    return out[0, 0]


def tv_loss_ref(image):
    x = image.astype(jnp.float32)
    h_var = x[:, 1:] - x[:, :-1]
    v_var = x[1:, :] - x[:-1, :]
    return jnp.sum(h_var ** 2) + jnp.sum(v_var ** 2)


if __name__ == "__main__":
    # Small demo shape matching the module's 2-D image input.
    H, W = 16, 16
    image = jax.random.normal(jax.random.PRNGKey(0), (H, W), dtype=jnp.float32)
    out = jax.block_until_ready(jax.jit(tv_loss)(image))
    ref = tv_loss_ref(image)
    assert jnp.allclose(out, ref, rtol=1e-5, atol=1e-5), (out, ref)

    # Multi-tile path: exercises the carried-row boundary, row masking
    # (H not a multiple of the tile) and lane masking (W not a multiple of 128).
    H2, W2 = 90, 272
    image2 = jax.random.normal(jax.random.PRNGKey(1), (H2, W2), dtype=jnp.float32)
    out2 = jax.block_until_ready(
        jax.jit(functools.partial(tv_loss, block_rows=16))(image2))
    ref2 = tv_loss_ref(image2)
    assert jnp.allclose(out2, ref2, rtol=1e-4, atol=1e-4), (out2, ref2)

    print("KERNEL_OK")
</pallas_src>

<mosaic_0001>
module attributes {stable_mosaic.version = 11 : i64} {
  func.func @_tv_loss_kernel(%arg0: i32, %arg1: memref<16x128xf32, #tpu.memory_space<vmem>>, %arg2: memref<1x1xf32, #tpu.memory_space<smem>>, %arg3: memref<1x1xf32, #tpu.memory_space<smem>>, %arg4: memref<1x128xf32, #tpu.memory_space<vmem>>) attributes {dimension_semantics = [#tpu.dimension_semantics<arbitrary>], iteration_bounds = array<i64: 1>, scalar_prefetch = 0 : i64, scratch_operands = 2 : i64, tpu.core_type = #tpu.core_type<tc>, window_params = [{transform_indices = @transform_0, window_bounds = array<i64: 16, 128>}, {transform_indices = @transform_1, window_bounds = array<i64: 1, 1>}]} {
    %c0_i32 = arith.constant 0 : i32
    %0 = arith.cmpi eq, %arg0, %c0_i32 : i32
    %1 = arith.extui %0 : i1 to i32
    %c0_i32_0 = arith.constant 0 : i32
    %2 = arith.cmpi ne, %1, %c0_i32_0 : i32
    scf.if %2 {
      %cst_24 = arith.constant 0.000000e+00 : f32
      %c0_25 = arith.constant 0 : index
      %c0_26 = arith.constant 0 : index
      %62 = memref.load %arg3[%c0_25, %c0_26] : memref<1x1xf32, #tpu.memory_space<smem>>
      memref.store %cst_24, %arg3[%c0_25, %c0_26] : memref<1x1xf32, #tpu.memory_space<smem>>
    } else {
    }
    %c0 = arith.constant 0 : index
    %c0_1 = arith.constant 0 : index
    %3 = vector.load %arg1[%c0, %c0_1] : memref<16x128xf32, #tpu.memory_space<vmem>>, vector<16x128xf32>
    %4 = tpu.iota {dimensions = array<i32: 1>} : vector<16x128xi32>
    %5 = tpu.iota {dimensions = array<i32: 0>} : vector<16x128xi32>
    %c16_i32 = arith.constant 16 : i32
    %6 = arith.muli %arg0, %c16_i32 : i32
    %7 = vector.broadcast %6 : i32 to vector<16x128xi32>
    %8 = arith.addi %5, %7 : vector<16x128xi32>
    %c127_i32 = arith.constant 127 : i32
    %9 = tpu.dynamic_rotate %3 by %c127_i32 dim 1 : vector<16x128xf32>, i32 -> vector<16x128xf32>
    %10 = arith.subf %9, %3 : vector<16x128xf32>
    %c15_i32 = arith.constant 15 : i32
    %11 = vector.broadcast %c15_i32 : i32 to vector<16x128xi32>
    %12 = arith.cmpi slt, %4, %11 : vector<16x128xi32>
    %c16_i32_2 = arith.constant 16 : i32
    %13 = vector.broadcast %c16_i32_2 : i32 to vector<16x128xi32>
    %14 = arith.cmpi slt, %8, %13 : vector<16x128xi32>
    %15 = arith.andi %12, %14 : vector<16x128xi1>
    %c15_i32_3 = arith.constant 15 : i32
    %16 = tpu.dynamic_rotate %3 by %c15_i32_3 dim 0 : vector<16x128xf32>, i32 -> vector<16x128xf32>
    %17 = arith.subf %16, %3 : vector<16x128xf32>
    %c15_i32_4 = arith.constant 15 : i32
    %18 = vector.broadcast %c15_i32_4 : i32 to vector<16x128xi32>
    %19 = arith.cmpi slt, %5, %18 : vector<16x128xi32>
    %c15_i32_5 = arith.constant 15 : i32
    %20 = vector.broadcast %c15_i32_5 : i32 to vector<16x128xi32>
    %21 = arith.cmpi slt, %8, %20 : vector<16x128xi32>
    %22 = arith.andi %19, %21 : vector<16x128xi1>
    %23 = arith.mulf %10, %10 : vector<16x128xf32>
    %cst = arith.constant 0.000000e+00 : f32
    %24 = vector.broadcast %cst : f32 to vector<16x128xf32>
    %25 = arith.select %15, %23, %24 : vector<16x128xi1>, vector<16x128xf32>
    %26 = arith.mulf %17, %17 : vector<16x128xf32>
    %cst_6 = arith.constant 0.000000e+00 : f32
    %27 = vector.broadcast %cst_6 : f32 to vector<16x128xf32>
    %28 = arith.select %22, %26, %27 : vector<16x128xi1>, vector<16x128xf32>
    %29 = arith.addf %25, %28 : vector<16x128xf32>
    %30 = vector.shape_cast %29 : vector<16x128xf32> to vector<1x16x128xf32>
    %cst_7 = arith.constant dense<0.000000e+00> : vector<1xf32>
    %31 = vector.multi_reduction <add>, %30, %cst_7 [1, 2] : vector<1x16x128xf32> to vector<1xf32>
    %32 = vector.shape_cast %31 : vector<1xf32> to vector<1x1x1xf32>
    %33 = vector.extract %32[0, 0, 0] : f32 from vector<1x1x1xf32>
    %c0_i32_8 = arith.constant 0 : i32
    %34 = arith.cmpi sgt, %arg0, %c0_i32_8 : i32
    %c16_i32_9 = arith.constant 16 : i32
    %35 = arith.muli %arg0, %c16_i32_9 : i32
    %c16_i32_10 = arith.constant 16 : i32
    %36 = arith.cmpi slt, %35, %c16_i32_10 : i32
    %37 = arith.andi %34, %36 : i1
    %38 = vector.extract_strided_slice %3 {offsets = [0, 0], sizes = [1, 128], strides = [1, 1]} : vector<16x128xf32> to vector<1x128xf32>
    %c0_11 = arith.constant 0 : index
    %c0_12 = arith.constant 0 : index
    %39 = vector.load %arg4[%c0_11, %c0_12] : memref<1x128xf32, #tpu.memory_space<vmem>>, vector<1x128xf32>
    %40 = arith.subf %38, %39 : vector<1x128xf32>
    %41 = vector.extract_strided_slice %4 {offsets = [0, 0], sizes = [1, 128], strides = [1, 1]} : vector<16x128xi32> to vector<1x128xi32>
    %c16_i32_13 = arith.constant 16 : i32
    %42 = vector.broadcast %c16_i32_13 : i32 to vector<1x128xi32>
    %43 = arith.cmpi slt, %41, %42 : vector<1x128xi32>
    %44 = vector.broadcast %37 : i1 to vector<1x128xi1>
    %45 = arith.andi %43, %44 : vector<1x128xi1>
    %46 = arith.mulf %40, %40 : vector<1x128xf32>
    %cst_14 = arith.constant 0.000000e+00 : f32
    %47 = vector.broadcast %cst_14 : f32 to vector<1x128xf32>
    %48 = arith.select %45, %46, %47 : vector<1x128xi1>, vector<1x128xf32>
    %c0_15 = arith.constant 0 : index
    %c0_16 = arith.constant 0 : index
    %49 = memref.load %arg3[%c0_15, %c0_16] : memref<1x1xf32, #tpu.memory_space<smem>>
    %50 = arith.addf %49, %33 : f32
    %51 = vector.shape_cast %48 : vector<1x128xf32> to vector<1x1x128xf32>
    %cst_17 = arith.constant dense<0.000000e+00> : vector<1xf32>
    %52 = vector.multi_reduction <add>, %51, %cst_17 [1, 2] : vector<1x1x128xf32> to vector<1xf32>
    %53 = vector.shape_cast %52 : vector<1xf32> to vector<1x1x1xf32>
    %54 = vector.extract %53[0, 0, 0] : f32 from vector<1x1x1xf32>
    %55 = arith.addf %50, %54 : f32
    %c0_18 = arith.constant 0 : index
    %c0_19 = arith.constant 0 : index
    %56 = memref.load %arg3[%c0_18, %c0_19] : memref<1x1xf32, #tpu.memory_space<smem>>
    memref.store %55, %arg3[%c0_18, %c0_19] : memref<1x1xf32, #tpu.memory_space<smem>>
    %57 = vector.extract_strided_slice %3 {offsets = [15, 0], sizes = [1, 128], strides = [1, 1]} : vector<16x128xf32> to vector<1x128xf32>
    %c0_20 = arith.constant 0 : index
    %c0_21 = arith.constant 0 : index
    %58 = vector.load %arg4[%c0_20, %c0_21] : memref<1x128xf32, #tpu.memory_space<vmem>>, vector<1x128xf32>
    tpu.vector_store %arg4[%c0_20, %c0_21], %57 {strides = array<i32>} : memref<1x128xf32, #tpu.memory_space<vmem>>, vector<1x128xf32>,
    %c0_i32_22 = arith.constant 0 : i32
    %59 = arith.cmpi eq, %arg0, %c0_i32_22 : i32
    %60 = arith.extui %59 : i1 to i32
    %c0_i32_23 = arith.constant 0 : i32
    %61 = arith.cmpi ne, %60, %c0_i32_23 : i32
    scf.if %61 {
      %c0_24 = arith.constant 0 : index
      %c0_25 = arith.constant 0 : index
      %62 = memref.load %arg3[%c0_24, %c0_25] : memref<1x1xf32, #tpu.memory_space<smem>>
      %c0_26 = arith.constant 0 : index
      %c0_27 = arith.constant 0 : index
      %63 = memref.load %arg2[%c0_26, %c0_27] : memref<1x1xf32, #tpu.memory_space<smem>>
      memref.store %62, %arg2[%c0_26, %c0_27] : memref<1x1xf32, #tpu.memory_space<smem>>
    } else {
    }
    return
  }
  func.func @transform_0(%arg0: i32) -> (i32, i32) {
    %c0_i32 = arith.constant 0 : i32
    %c0_i32_0 = arith.constant 0 : i32
    return %arg0, %c0_i32 : i32, i32
  }
  func.func @transform_1(%arg0: i32) -> (i32, i32) {
    %c0_i32 = arith.constant 0 : i32
    %c0_i32_0 = arith.constant 0 : i32
    %c0_i32_1 = arith.constant 0 : i32
    return %c0_i32, %c0_i32_0 : i32, i32
  }
}

</mosaic_0001>

<bundles_post_ra>
// kernel: tv_loss.1
= control target key start
LH: loop header
LB: loop body
LE: loop exit
PB: predicated region body
PF: predicated region fallthrough
CT: control target
= control target key end

     0   :  { %s169_s0 = inlined_call_operand.vmem [shape: f32[16,128], index: 0, kind: input, shape index: {}]   ;;  %s170_s1 = inlined_call_operand.hbm [shape: f32[1,1], index: 1, kind: output, shape index: {}]  }
   0x1   :  { %v15_v0 = vld [vmem:[%s169_s0] sm:$0xff]  ;;  %v16_v1 = vld [vmem:[%s169_s0 + $0x8] sm:$0xff] }
   0x2   :  { %6 = vsyncpa [#allocation5], 0  ;;  %s138_s10 = smov 127   ;;  %v17_v2 = vlaneseq  ;;  %v37_v4 = vrot.slane %v15_v0, 1  ;;  %v38_v5 = vrot.slane %v16_v1, 1  ;;  %v139_v26 = vmov 0.0  }
   0x3   :  { %26 = vrot.lane.b32.xlu0 %v15_v0, %s138_s10  ;;  %s126_s15 = scalar_lea.hbm %s170_s1, 16 }
   0x4   :  { %v20_v3 = vshrl.u32 %v17_v2, 7  ;;  %v18_v11 = vand.u32 127, %v17_v2  ;;  %p127_p0 = scmp.ne.s32.totalorder %s170_s1, %s126_s15  ;;  %p130_p1 = scmp.lt.u32.totalorder %s126_s15, %s170_s1 }
   0x6   :  { %vm39_vm0 = vcmp.lt.s32.totalorder %v20_v3, 7  ;;  %v21_v7 = vadd.s32 8, %v20_v3  ;;  %vm32_vm2 = vcmp.lt.s32.totalorder %v18_v11, 15  ;;  %p132_p2 = pnand %p130_p1, %p127_p0 }
   0x7   :  { %28 = vrot.lane.b32.xlu0 %v16_v1, %s138_s10  ;;  %v41_v6 = vsel %vm39_vm0, %v38_v5, %v37_v4  ;;  %v40_v8 = vsel %vm39_vm0, %v37_v4, %v38_v5 }
   0x8   :  { %v43_v9 = vsub.f32 %v41_v6, %v16_v1  ;;  %vm45_vm1 = vcmp.lt.s32.totalorder %v21_v7, 15  ;;  %v42_v13 = vsub.f32 %v40_v8, %v15_v0 }
   0x9   :  { %vm49_vm3 = vmand %vm45_vm1, %vm45_vm1 }
   0xa   :  { %v55_v15 = vmul.f32 %v43_v9, %v43_v9  ;;  %v54_v18 = vmul.f32 %v42_v13, %v42_v13 }
   0xc   :  { %v57_v21 = vsel %vm49_vm3, %v55_v15, 0.0 }
  0x75   :  { %v27_v10 = vpop.permute.xlu0 %26 }
  0x76   :  { %v30_v12 = vsub.f32 %v27_v10, %v15_v0 }
  0x78   :  { %v50_v14 = vmul.f32 %v30_v12, %v30_v12 }
  0x79   :  { %v29_v16 = vpop.permute.xlu0 %28 }
  0x7a   :  { %v31_v17 = vsub.f32 %v29_v16, %v16_v1  ;;  %v52_v20 = vsel %vm32_vm2, %v50_v14, 0.0 }
  0x7b   :  { %v58_v23 = vadd.f32 %v54_v18, %v52_v20 }
  0x7c   :  { %v51_v19 = vmul.f32 %v31_v17, %v31_v17 }
  0x7e   :  { %v53_v22 = vsel %vm32_vm2, %v51_v19, 0.0 }
  0x7f   :  { %v59_v24 = vadd.f32 %v57_v21, %v53_v22 }
  0x81   :  { %v60_v25 = vadd.f32 %v59_v24, %v58_v23 }
  0x83   :  { %61 = vadd.xlane.f32.xlu1 %v60_v25 }
  0x87   :  { %87 = vadd.xlane.f32.xlu1 %v139_v26 }
 0x110   :  { %v62_v27 = vpop.xlane.xlu1 %61 }
 0x111   :  { %v63_v28 = vrot.slane %v62_v27, 4 }
 0x113   :  { %v64_v29 = vadd.f32 %v63_v28, %v62_v27 }
 0x114   :  { %v88_v30 = vpop.xlane.xlu1 %87 }
 0x115   :  { %v65_v31 = vrot.slane %v64_v29, 2  ;;  %v89_v32 = vrot.slane %v88_v30, 4 }
 0x117   :  { %v90_v33 = vadd.f32 %v89_v32, %v88_v30  ;;  %v66_v34 = vadd.f32 %v65_v31, %v64_v29 }
 0x119   :  { %v91_v35 = vrot.slane %v90_v33, 2  ;;  %v67_v36 = vrot.slane %v66_v34, 1 }
 0x11b   :  { %v92_v37 = vadd.f32 %v91_v35, %v90_v33  ;;  %v68_v38 = vadd.f32 %v67_v36, %v66_v34 }
 0x11d   :  { %119 = vpush %v68_v38  ;;  %v93_v39 = vrot.slane %v92_v37, 1 }
 0x11f   :  { %v94_v40 = vadd.f32 %v93_v39, %v92_v37 }
 0x121   :  { %121 = vpush %v94_v40 }
 0x14e   :  { %s120_s0 = spop %119 }
 0x152   :  { %s122_s11 = spop %121 }
 0x153   :  { %s96_s12 = sadd.f32 %s122_s11, %s120_s0 }
 0x155   :  { %105 = sst [smem:[#allocation4]] %s96_s12 }
 0x156   :  { %135 = shalt.err (!%p132_p2)
}
 0x157   :  { %s140_s20 = smov [#allocation4]  }
 0x158   :  { %113 = dma.smem_to_hbm %s140_s20, 16, %s170_s1, [#allocation5]  }
 0x159   :  { %136 = dma.done.wait [#allocation5], 16  }
 0x15a   :  { %137 = vsyncadd [#allocation5], 4294967280 }
 0x15b   :  { %117 = sfence }
 0x15c   :  { %118 = vsyncpa [#allocation5], 1 }

</bundles_post_ra>
